<compile_context>
chip_gen: v7x
topology: tpu7x:2x2x1
jax: 0.10.0
libtpu: 0.0.40
codegen_flags: <defaults>
</compile_context>

<pallas_src>
import functools

import jax
import jax.numpy as jnp
from jax.experimental import pallas as pl
from jax.experimental.pallas import tpu as pltpu


def _round_up(x: int, m: int) -> int:
    return (x + m - 1) // m * m


# --------------------------------------------------------------------------- #
# Resident fast path: whole embedding lives in VMEM, DMA'd exactly once.
# --------------------------------------------------------------------------- #
def _attention_resident_kernel(inv_n, emb_ref, w_ref, out_ref):
    emb = emb_ref[...].astype(jnp.float32)                        # (N, F)
    w = w_ref[...].astype(jnp.float32)                            # (F, F)
    col_mean = jnp.sum(emb, axis=0, keepdims=True) * inv_n        # (1, F)
    tg = jnp.tanh(jnp.dot(col_mean, w,
                          preferred_element_type=jnp.float32))    # (1, F)
    logits = jnp.sum(emb * tg, axis=-1, keepdims=True)            # (N, 1) on VPU
    scores = jax.nn.sigmoid(logits)
    out_ref[...] = jnp.sum(emb * scores, axis=0, keepdims=True)   # (1, F) lane-dense


# --------------------------------------------------------------------------- #
# Streaming path (large N): two parallel-shardable kernels + tiny XLA glue.
# --------------------------------------------------------------------------- #
def _mask_rows(emb, tile_idx, n_rows):
    tile_n = emb.shape[0]
    row = jax.lax.broadcasted_iota(jnp.int32, (tile_n, 1), 0) + tile_idx * tile_n
    return jnp.where(row < n_rows, emb, 0.0)


def _colsum_kernel(n_rows, needs_mask, emb_ref, psum_ref):
    emb = emb_ref[...].astype(jnp.float32)                        # (tile_n, F)
    if needs_mask:
        emb = _mask_rows(emb, pl.program_id(0), n_rows)
    psum_ref[...] = jnp.sum(emb, axis=0, keepdims=True).reshape(psum_ref.shape)


def _weighted_colsum_kernel(n_rows, needs_mask, tg_ref, emb_ref, prep_ref):
    emb = emb_ref[...].astype(jnp.float32)                        # (tile_n, F)
    if needs_mask:
        emb = _mask_rows(emb, pl.program_id(0), n_rows)
    tg = tg_ref[...]                                              # (1, F) f32
    # logits on the VPU (lane reduce) — zeroed rows give 0 * sigmoid(0) = 0.
    scores = jax.nn.sigmoid(jnp.sum(emb * tg, axis=-1, keepdims=True))
    prep_ref[...] = jnp.sum(emb * scores, axis=0,
                            keepdims=True).reshape(prep_ref.shape)


# --------------------------------------------------------------------------- #
# Wrapper
# --------------------------------------------------------------------------- #
def attention_module_forward(embedding: jax.Array,
                             weight_matrix: jax.Array,
                             *,
                             stream_dtype=None,
                             max_tile_n: int = 2048,
                             resident_vmem_budget_bytes: int = 40 * 1024 * 1024
                             ) -> jax.Array:
    n, f = embedding.shape
    assert weight_matrix.shape == (f, f)

    # Optional low-precision streaming of the dominant operand (accumulation in
    # the kernels stays f32). In real use callers would already hold bf16.
    if stream_dtype is not None:
        embedding = embedding.astype(stream_dtype)

    esize = jnp.dtype(embedding.dtype).itemsize
    wsize = jnp.dtype(weight_matrix.dtype).itemsize
    emb_bytes = n * f * esize
    w_bytes = f * f * wsize

    # -------- resident fast path: one DMA of the embedding, both passes in VMEM
    resident_need = emb_bytes + w_bytes + 4 * f + (1 << 20)        # + headroom
    if resident_need <= resident_vmem_budget_bytes:
        vmem_limit = int(min(48 << 20, max(16 << 20, resident_need + (4 << 20))))
        rep_row = pl.pallas_call(
            functools.partial(_attention_resident_kernel, 1.0 / n),
            out_shape=jax.ShapeDtypeStruct((1, f), jnp.float32),
            compiler_params=pltpu.CompilerParams(vmem_limit_bytes=vmem_limit),
        )(embedding, weight_matrix)
        return rep_row.reshape(f, 1)

    # -------- streaming path: large N, tiles sized from a DMA budget ---------
    per_row = f * esize
    tile_n = max(8, min(max_tile_n, ((16 << 20) // (2 * per_row)) // 8 * 8))
    tile_n = min(tile_n, _round_up(n, 8))
    n_tiles = pl.cdiv(n, tile_n)
    needs_mask = (n % tile_n) != 0
    vmem_limit = int(min(48 << 20, max(16 << 20, 4 * tile_n * per_row)))
    cparams = pltpu.CompilerParams(
        dimension_semantics=("parallel",),      # disjoint outputs -> megacore OK
        vmem_limit_bytes=vmem_limit,
    )

    # Pass 1: per-tile partial column sums (n_tiles, 1, F).
    psums = pl.pallas_call(
        functools.partial(_colsum_kernel, n, needs_mask),
        out_shape=jax.ShapeDtypeStruct((n_tiles, 1, f), jnp.float32),
        grid=(n_tiles,),
        in_specs=[pl.BlockSpec((tile_n, f), lambda k: (k, 0))],
        out_specs=pl.BlockSpec((1, 1, f), lambda k: (k, 0, 0)),
        compiler_params=cparams,
    )(embedding)

    # Tiny (1,F)@(F,F) + tanh in plain XLA (per review; keeps W out of the
    # streaming kernels entirely, so no double-buffered W footprint on v7x).
    col_mean = jnp.sum(psums, axis=0) * (1.0 / n)                          # (1, F)
    tg = jnp.tanh(col_mean @ weight_matrix.astype(jnp.float32))            # (1, F)

    # Pass 2: per-tile sigmoid-score-weighted partial column sums.
    preps = pl.pallas_call(
        functools.partial(_weighted_colsum_kernel, n, needs_mask),
        out_shape=jax.ShapeDtypeStruct((n_tiles, 1, f), jnp.float32),
        grid=(n_tiles,),
        in_specs=[pl.BlockSpec((1, f), lambda k: (0, 0)),                  # tg resident
                  pl.BlockSpec((tile_n, f), lambda k: (k, 0))],
        out_specs=pl.BlockSpec((1, 1, f), lambda k: (k, 0, 0)),
        compiler_params=cparams,
    )(tg, embedding)

    rep_row = jnp.sum(preps, axis=0)                                       # (1, F)
    return rep_row.reshape(f, 1)


def xavier_uniform(key, fan_in, fan_out, dtype=jnp.float32):
    bound = (6.0 / (fan_in + fan_out)) ** 0.5
    return jax.random.uniform(key, (fan_in, fan_out), dtype=dtype,
                              minval=-bound, maxval=bound)


def _reference(emb, w):
    gc = jnp.mean(emb @ w, axis=0)
    tg = jnp.tanh(gc)
    scores = jax.nn.sigmoid(emb @ tg.reshape(-1, 1))
    return emb.T @ scores


if __name__ == "__main__":
    key = jax.random.PRNGKey(0)
    k_emb, k_w, k_emb2, k_w2 = jax.random.split(key, 4)

    # 1) Small case (typical GNN readout): resident fast path, single DMA.
    N, F = 8, 32
    embedding = jax.random.normal(k_emb, (N, F), dtype=jnp.float32)
    weight_matrix = xavier_uniform(k_w, F, F)        # nn.init.xavier_uniform_ equiv.
    rep = jax.block_until_ready(attention_module_forward(embedding, weight_matrix))
    ref = _reference(embedding, weight_matrix)
    assert rep.shape == (F, 1)
    assert jnp.allclose(rep, ref, atol=1e-4, rtol=1e-4), "resident-case mismatch"

    # 2) Larger case on the resident path (default budget): N*F f32 = 512 KiB.
    N2, F2 = 1000, 128
    embedding2 = jax.random.normal(k_emb2, (N2, F2), dtype=jnp.float32)
    weight_matrix2 = xavier_uniform(k_w2, F2, F2)
    rep2 = jax.block_until_ready(attention_module_forward(embedding2, weight_matrix2))
    ref2 = _reference(embedding2, weight_matrix2)
    assert rep2.shape == (F2, 1)
    assert jnp.allclose(rep2, ref2, atol=1e-3, rtol=1e-3), "resident-large mismatch"

    # 3) Force the streaming/split path (parallel N tiles, ragged last tile masked
    #    in-kernel, no wrapper pad): 1000 rows -> 4 tiles of 256 (last = 232).
    rep3 = jax.block_until_ready(attention_module_forward(
        embedding2, weight_matrix2,
        resident_vmem_budget_bytes=0, max_tile_n=256))
    assert rep3.shape == (F2, 1)
    assert jnp.allclose(rep3, ref2, atol=1e-3, rtol=1e-3), "streaming-case mismatch"

    # 4) bf16 streaming (halved HBM bytes), f32 accumulation; compare against a
    #    reference computed on the bf16-rounded embedding (looser tolerance).
    rep4 = jax.block_until_ready(attention_module_forward(
        embedding2, weight_matrix2,
        stream_dtype=jnp.bfloat16,
        resident_vmem_budget_bytes=0, max_tile_n=256))
    emb_bf = embedding2.astype(jnp.bfloat16).astype(jnp.float32)
    ref4 = _reference(emb_bf, weight_matrix2)
    assert rep4.shape == (F2, 1)
    assert jnp.allclose(rep4, ref4, atol=5e-2, rtol=2e-2), "bf16-streaming mismatch"

    print("KERNEL_OK")
</pallas_src>

<mosaic_0001>
module attributes {stable_mosaic.version = 11 : i64} {
  func.func @_attention_resident_kernel(%arg0: memref<8x32xf32, #tpu.memory_space<vmem>>, %arg1: memref<32x32xf32, #tpu.memory_space<vmem>>, %arg2: memref<1x32xf32, #tpu.memory_space<vmem>>) attributes {dimension_semantics = [], scalar_prefetch = 0 : i64, scratch_operands = 0 : i64, tpu.core_type = #tpu.core_type<tc>} {
    %c0 = arith.constant 0 : index
    %c0_0 = arith.constant 0 : index
    %0 = vector.load %arg0[%c0, %c0_0] : memref<8x32xf32, #tpu.memory_space<vmem>>, vector<8x32xf32>
    %c0_1 = arith.constant 0 : index
    %c0_2 = arith.constant 0 : index
    %1 = vector.load %arg1[%c0_1, %c0_2] : memref<32x32xf32, #tpu.memory_space<vmem>>, vector<32x32xf32>
    %cst = arith.constant dense<0.000000e+00> : vector<32xf32>
    %2 = vector.multi_reduction <add>, %0, %cst [0] : vector<8x32xf32> to vector<32xf32>
    %3 = vector.shape_cast %2 : vector<32xf32> to vector<1x32xf32>
    %cst_3 = arith.constant 1.250000e-01 : f32
    %4 = vector.broadcast %cst_3 : f32 to vector<1x32xf32>
    %5 = arith.mulf %3, %4 : vector<1x32xf32>
    %cst_4 = arith.constant dense<0.000000e+00> : vector<1x32xf32>
    %6 = tpu.matmul %5, %1, %cst_4 {dimension_numbers = #tpu.dot_dimension_numbers<[1], [0], [0], [1], [0, 0, 1, 1], [], []>} : vector<1x32xf32>, vector<32x32xf32>, vector<1x32xf32> -> vector<1x32xf32>
    %7 = math.tanh %6 : vector<1x32xf32>
    %8 = vector.broadcast %7 : vector<1x32xf32> to vector<8x32xf32>
    %9 = arith.mulf %0, %8 : vector<8x32xf32>
    %cst_5 = arith.constant dense<0.000000e+00> : vector<8xf32>
    %10 = vector.multi_reduction <add>, %9, %cst_5 [1] : vector<8x32xf32> to vector<8xf32>
    %11 = vector.shape_cast %10 : vector<8xf32> to vector<8x1xf32>
    %12 = arith.negf %11 : vector<8x1xf32>
    %13 = math.exp %12 : vector<8x1xf32>
    %cst_6 = arith.constant 1.000000e+00 : f32
    %14 = vector.broadcast %cst_6 : f32 to vector<8x1xf32>
    %15 = arith.addf %14, %13 : vector<8x1xf32>
    %16 = arith.divf %14, %15 : vector<8x1xf32>
    %17 = vector.broadcast %16 : vector<8x1xf32> to vector<8x32xf32>
    %18 = arith.mulf %0, %17 : vector<8x32xf32>
    %cst_7 = arith.constant dense<0.000000e+00> : vector<32xf32>
    %19 = vector.multi_reduction <add>, %18, %cst_7 [0] : vector<8x32xf32> to vector<32xf32>
    %20 = vector.shape_cast %19 : vector<32xf32> to vector<1x32xf32>
    %c0_8 = arith.constant 0 : index
    %c0_9 = arith.constant 0 : index
    %21 = vector.load %arg2[%c0_8, %c0_9] : memref<1x32xf32, #tpu.memory_space<vmem>>, vector<1x32xf32>
    tpu.vector_store %arg2[%c0_8, %c0_9], %20 {strides = array<i32>} : memref<1x32xf32, #tpu.memory_space<vmem>>, vector<1x32xf32>,
    return
  }
}

</mosaic_0001>

<bundles_post_ra>
// kernel: tpu_custom_call.1
= control target key start
LH: loop header
LB: loop body
LE: loop exit
PB: predicated region body
PF: predicated region fallthrough
CT: control target
= control target key end

     0   :  { %7 = vsyncpa [#allocation3], 0  ;;  %s346_s0 = inlined_call_operand.hbm [shape: f32[8,32], index: 0, kind: input, shape index: {}]   ;;  %s347_s1 = inlined_call_operand.hbm [shape: f32[32,32], index: 1, kind: input, shape index: {}]   ;;  %s348_s2 = inlined_call_operand.hbm [shape: f32[1,32], index: 2, kind: output, shape index: {}]  }
   0x1   :  { %8 = vsyncpa [#allocation6], 0 }
   0x2   :  { %9 = vsyncpa [#allocation4], 0  ;;  %s276_s9 = smov [#allocation2]   ;;  %s277_s11 = smov [#allocation5]  }
   0x3   :  { %s16_s10 = sshll.u32 %s276_s9, 4  ;;  %s25_s12 = sshll.u32 %s277_s11, 4  ;;  %s17_s10 = int_to_ptr.vmem [resolvable:$true] %s16_s10  ;;  %s299_s12 = int_to_ptr.vmem [resolvable:$true] %s25_s12 }
   0x4   :  { %s204_s15 = scalar_lea.hbm %s346_s0, 128 }
   0x5   :  { %p205_p0 = scmp.ne.s32.totalorder %s346_s0, %s204_s15  ;;  %p208_p1 = scmp.lt.u32.totalorder %s204_s15, %s346_s0 }
   0x7   :  { %p210_p2 = pnand %p208_p1, %p205_p0 }
   0x9   :  { %213 = shalt.err (!%p210_p2)
}
   0xa   :  { %s214_s20 = scalar_lea.vmem %s17_s10, 128  ;;  %p219_p4 = scmp.lt.s32.totalorder %s17_s10, %s17_s10 }
   0xb   :  { %p215_p3 = scmp.ne.s32.totalorder %s17_s10, %s214_s20  ;;  %p220_p5 = scmp.lt.s32.totalorder %s214_s20, %s214_s20 }
   0xd   :  { %p221_p6 = por %p220_p5, %p219_p4 }
   0xf   :  { %p222_p7 = pnand %p221_p6, %p215_p3 }
  0x11   :  { %225 = shalt.err (!%p222_p7)
}
  0x12   :  { %19 = dma.hbm_to_vmem [thread:$0]  %s346_s0, 128, %s17_s10, [#allocation3]  }
  0x13   :  { %s226_s25 = scalar_lea.hbm %s347_s1, 512 }
  0x14   :  { %p227_p8 = scmp.ne.s32.totalorder %s347_s1, %s226_s25  ;;  %p230_p9 = scmp.lt.u32.totalorder %s226_s25, %s347_s1 }
  0x16   :  { %p232_p10 = pnand %p230_p9, %p227_p8 }
  0x18   :  { %235 = shalt.err (!%p232_p10)
}
  0x19   :  { %s236_s30 = scalar_lea.vmem %s299_s12, 512  ;;  %p241_p12 = scmp.lt.s32.totalorder %s299_s12, %s299_s12 }
  0x1a   :  { %p237_p11 = scmp.ne.s32.totalorder %s299_s12, %s236_s30  ;;  %p242_p13 = scmp.lt.s32.totalorder %s236_s30, %s236_s30 }
  0x1c   :  { %p243_p0 = por %p242_p13, %p241_p12 }
  0x1e   :  { %p244_p1 = pnand %p243_p0, %p237_p11 }
  0x20   :  { %247 = shalt.err (!%p244_p1)
}
  0x21   :  { %s278_s0 = smov 128   ;;  %s279_s3 = smov 8  }
  0x22   :  { %31 = dma.hbm_to_vmem [thread:$0]  %s347_s1, 512, %s299_s12, [#allocation6], %s278_s0, %s278_s0, %s279_s3  }
  0x23   :  { %270 = dma.done.wait [#allocation3], 128  }
  0x24   :  { %271 = vsyncadd [#allocation3], 4294967168 }
  0x25   :  { %272 = dma.done.wait [#allocation6], 512  }
  0x26   :  { %273 = vsyncadd [#allocation6], 4294966784  ;;  %v280_v0 = vmov 0.0|0.0   ;;  %vm281_vm0 = vmmov 0   ;;  %v282_v1 = vmov 0.0   ;;  %vm43_vm1 = vcmask 261120  }
  0x27   :  { %184 = vmatprep.subr.bf16.mxu0 %v280_v0  ;;  %181 = vmatprep.mubr.msk.f32.mxu0 %vm281_vm0, %v282_v1  ;;  %v39_v2 = vld [vmem:[#allocation5] sm:$0xff]  ;;  %v40_v3 = vld [vmem:[#allocation5 + $0x8] sm:$0xff]  ;;  %v41_v4 = vld [vmem:[#allocation5 + $0x10] sm:$0xff]  ;;  %v126_v18 = vlaneseq  ;;  %s283_s1 = smov [#allocation7]   ;;  %vm148_vm2 = vcmask 253952  }
  0x28   :  { %v185_v5 = vpack.c.bf16 %v40_v3, %v39_v2  ;;  %v42_v6 = vld [vmem:[#allocation5 + $0x18] sm:$0xff]  ;;  %s156_s6 = sshll.u32 %s283_s1, 4  ;;  %s157_s6 = int_to_ptr.vmem [resolvable:$true] %s156_s6 }
  0x29   :  { %v38_v7 = vld [vmem:[#allocation2] sm:$0xff]  ;;  %v188_v9 = vpack.c.bf16 %v42_v6, %v41_v4  ;;  %v127_v20 = vshrl.u32 %v126_v18, 7  ;;  %s248_s7 = scalar_lea.vmem %s157_s6, 16  ;;  %s252_s8 = scalar_lea.vmem %s157_s6, 32 }
  0x2a   :  { %v44_v8 = vsel %vm43_vm1, %v38_v7, 0.0  ;;  %186 = vmatpush3.bf16.msra.mxu0 %v185_v5  ;;  %p249_p2 = scmp.ne.s32.totalorder %s157_s6, %s248_s7  ;;  %p253_p3 = scmp.lt.s32.totalorder %s157_s6, %s157_s6 }
  0x2b   :  { %v45_v10 = vrot.slane %v44_v8, 4  ;;  %187 = vmatprep.subr.bf16.mxu0 %v280_v0  ;;  %v128_v21 = vsub.s32 0, %v127_v20  ;;  %p254_p4 = scmp.lt.s32.totalorder %s252_s8, %s248_s7 }
  0x2d   :  { %v46_v11 = vadd.f32 %v45_v10, %v44_v8  ;;  %p255_p5 = por %p254_p4, %p253_p3 }
  0x2e   :  { %189 = vmatpush3.bf16.msra.mxu0 %v188_v9 }
  0x2f   :  { %v47_v12 = vrot.slane %v46_v11, 2  ;;  %p256_p6 = pnand %p255_p5, %p249_p2 }
  0x31   :  { %v48_v13 = vadd.f32 %v47_v12, %v46_v11 }
  0x33   :  { %v49_v14 = vrot.slane %v48_v13, 1 }
  0x35   :  { %v50_v15 = vadd.f32 %v49_v14, %v48_v13 }
  0x37   :  { %v51_v16 = vmul.f32 0.125, %v50_v15 }
  0x39   :  { %182 = vmatmul.mubr.msk.f32.vlgmr.msra.gmra.mrb[0].mxu0 %vm43_vm1, %v51_v16 }
 0x10c   :  { %v121_v17 = vpop.f32.mrb[0].mxu0 }
 0x10d   :  { %198 = vtanh.f32 %v121_v17  ;;  %v183_v19 = vpop.f32.mrb[1].mxu0 }
 0x117   :  { %v199_v22 = vpop.eup %198 }
 0x118   :  { %v129_v23 = vrot.slane %v199_v22, %v128_v21 }
 0x11a   :  { %v130_v24 = vmul.f32 %v129_v23, %v38_v7 }
 0x11c   :  { %v131_v25 = vsel %vm43_vm1, %v130_v24, 0.0 }
 0x11d   :  { %132 = vadd.xlane.f32.xlu0 %v131_v25 }
 0x1aa   :  { %v133_v26 = vpop.xlane.xlu0 %132 }
 0x1ab   :  { %v167_v27 = vmul.f32 -1.442695, %v133_v26 }
 0x1ad   :  { %200 = vpow2.f32 %v167_v27 }
 0x1b7   :  { %v201_v28 = vpop.eup %200 }
 0x1b8   :  { %v137_v29 = vadd.f32 1.0, %v201_v28 }
 0x1ba   :  { %202 = vrcp.f32 %v137_v29 }
 0x1c4   :  { %v203_v30 = vpop.eup %202 }
 0x1c5   :  { %v140_v31 = vmul.f32 %v203_v30, %v38_v7 }
 0x1c7   :  { %v141_v32 = vsel %vm43_vm1, %v140_v31, 0.0 }
 0x1c8   :  { %v142_v33 = vrot.slane %v141_v32, 4 }
 0x1ca   :  { %v143_v34 = vadd.f32 %v142_v33, %v141_v32 }
 0x1cc   :  { %v144_v35 = vrot.slane %v143_v34, 2 }
 0x1ce   :  { %v145_v36 = vadd.f32 %v144_v35, %v143_v34 }
 0x1d0   :  { %v146_v37 = vrot.slane %v145_v36, 1 }
 0x1d2   :  { %v147_v38 = vadd.f32 %v146_v37, %v145_v36 }
 0x1d4   :  { %149 = vst.msk [vmem:[#allocation7] sm:$0x1] %vm148_vm2, %v147_v38 }
 0x1d5   :  { %259 = shalt.err (!%p256_p6)
}
 0x1d6   :  { %s260_s11 = scalar_lea.hbm %s348_s2, 16 }
 0x1d7   :  { %p261_p7 = scmp.ne.s32.totalorder %s348_s2, %s260_s11  ;;  %p264_p8 = scmp.lt.u32.totalorder %s260_s11, %s348_s2 }
 0x1d9   :  { %p266_p9 = pnand %p264_p8, %p261_p7 }
 0x1db   :  { %269 = shalt.err (!%p266_p9)
}
 0x1dc   :  { %159 = dma.vmem_to_hbm [thread:$0]  %s157_s6, 16, %s348_s2, [#allocation4]  }
 0x1dd   :  { %274 = dma.done.wait [#allocation4], 16  }
 0x1de   :  { %275 = vsyncadd [#allocation4], 4294967280 }
 0x1df   :  { %163 = vsyncpa [#allocation3], 1 }
 0x1e0   :  { %164 = vsyncpa [#allocation6], 1 }
 0x1e1   :  { %165 = vsyncpa [#allocation4], 1 }

</bundles_post_ra>
